<compile_context>
chip_gen: v7x
topology: tpu7x:2x2x1
jax: 0.10.0
libtpu: 0.0.40
codegen_flags: <defaults>
</compile_context>

<pallas_src>
import functools

import jax
import jax.numpy as jnp
from jax.experimental import pallas as pl
from jax.experimental.pallas import tpu as pltpu

EPSILON = 0.1


def _ls_ce_tile_kernel(preds_ref, target_ref, out_ref, *, n_rows_total):
    i = pl.program_id(0)
    x = preds_ref[...]                                   # (TN, C), native dtype (bf16 ok)
    tn, c = x.shape

    # Row max and the one-hot target gather are exact in the native dtype
    # (no arithmetic), so they run on the packed tile; only per-row scalars
    # are upcast to f32.
    m = jnp.max(x, axis=-1, keepdims=True).astype(jnp.float32)            # (TN, 1)
    tgt = target_ref[...]                                                 # (TN, 1) int32
    col = jax.lax.broadcasted_iota(jnp.int32, x.shape, 1)
    x_tgt = jnp.sum(jnp.where(col == tgt, x, jnp.zeros_like(x)),
                    axis=-1, keepdims=True, dtype=jnp.float32)            # (TN, 1)
    sum_x = jnp.sum(x, axis=-1, keepdims=True, dtype=jnp.float32)         # (TN, 1)

    # f32 exp path: `shifted` is the only full-tile f32 temporary and is
    # consumed solely by exp (kept f32 for numerical tolerance on all gens).
    shifted = x.astype(jnp.float32) - m                                   # (TN, C)
    lse = jnp.log(jnp.sum(jnp.exp(shifted), axis=-1, keepdims=True))      # (TN, 1)

    # sum_c log_softmax = sum_x - C*(m + lse);  log_softmax[tgt] = x[tgt] - m - lse
    m_lse = m + lse
    sum_lp = sum_x - jnp.float32(c) * m_lse
    picked = x_tgt - m_lse

    # Mask padded tail rows (when N is not a multiple of TN).  Padded rows may
    # read garbage HBM data; the mask is applied before any cross-row reduce.
    row = jax.lax.broadcasted_iota(jnp.int32, (tn, 1), 0)
    valid = (i * tn + row) < n_rows_total
    loss_partial = jnp.sum(jnp.where(valid, -sum_lp, 0.0))                # scalar
    nll_partial = jnp.sum(jnp.where(valid, -picked, 0.0))                 # scalar

    # Lane-dense (8, 128) output block: (0,0)=loss partial, (0,1)=nll partial.
    r_i = jax.lax.broadcasted_iota(jnp.int32, (8, 128), 0)
    l_i = jax.lax.broadcasted_iota(jnp.int32, (8, 128), 1)
    out_ref[...] = jnp.where(
        (r_i == 0) & (l_i == 0), loss_partial,
        jnp.where((r_i == 0) & (l_i == 1), nll_partial, 0.0))


def _vmem_limit_bytes():
    """Generation-aware compiler VMEM limit (~75% of physical per-TC VMEM).

    ~48 MiB on v7x (64 MiB physical), ~96 MiB on v5e/v6e (128 MiB physical).
    Falls back to a conservative v7x-sized value if the query is unavailable.
    """
    vmem = None
    try:
        info = pltpu.get_tpu_info()
        vmem = getattr(info, "vmem_capacity_bytes", None)
    except Exception:
        vmem = None
    if not vmem:
        vmem = 64 * 1024 * 1024
    return int((vmem * 3) // 4)


def _pick_row_tile(n, c, in_itemsize, tile_budget_bytes):
    """Largest multiple-of-8 row tile whose true per-tile footprint fits budget.

    Accounts for what the kernel actually keeps live per row of a tile:
      2 * C * in_itemsize   double-buffered preds DMA tile
      1 * C * in_itemsize   one-hot select result on the native-dtype tile
      2 * C * 4             f32 temporaries (shifted / exp(shifted))
      1 * C * 4             int32 column iota
      ~8 * 128 * 4          lane-padded target block (x2 buffers) + per-row
                            f32 scalars (m, lse, sum_x, x_tgt, ...)
    """
    bytes_per_row = (3 * c * in_itemsize) + (3 * c * 4) + (8 * 128 * 4)
    tn = tile_budget_bytes // max(1, bytes_per_row)
    tn = max(8, min(4096, (tn // 8) * 8))
    n_pad = ((n + 7) // 8) * 8
    return min(tn, n_pad)


def label_smoothing_cross_entropy(preds, target, epsilon=EPSILON):
    """preds: (N, C) float; target: (N,) int. Returns scalar f32 loss.

    Matches the PyTorch module exactly, i.e. the combine is
    eps*(loss/C) + (1 - 2*eps)*nll (linear_combination uses 1 - epsilon*2).
    No ignore_index support; out-of-range targets (>= C) silently contribute
    only -logsumexp to the nll term (PyTorch would raise).
    """
    n, c = preds.shape
    target_2d = target.astype(jnp.int32).reshape(n, 1)

    vmem_limit = _vmem_limit_bytes()
    # Size tiles to ~7/8 of the compiler limit: headroom for the output block,
    # DMA semaphores and internal compiler scratch.
    tn = _pick_row_tile(n, c, preds.dtype.itemsize, (vmem_limit * 7) // 8)
    num_tiles = pl.cdiv(n, tn)

    kernel = functools.partial(_ls_ce_tile_kernel, n_rows_total=n)
    partials = pl.pallas_call(
        kernel,
        out_shape=jax.ShapeDtypeStruct((num_tiles * 8, 128), jnp.float32),
        grid=(num_tiles,),
        in_specs=[
            # Keep HBM dtype (bf16 stays bf16); default double-buffering only.
            pl.BlockSpec((tn, c), lambda i: (i, 0)),
            pl.BlockSpec((tn, 1), lambda i: (i, 0)),
        ],
        out_specs=pl.BlockSpec((8, 128), lambda i: (i, 0)),
        compiler_params=pltpu.CompilerParams(
            dimension_semantics=("parallel",),          # lets v7x use both TCs
            vmem_limit_bytes=vmem_limit,
        ),
    )(preds, target_2d)

    # Tiny cross-tile reduction + epsilon combine (reciprocal multiplies).
    loss_sum = jnp.sum(partials[:, 0])
    nll_sum = jnp.sum(partials[:, 1])
    inv_n = jnp.float32(1.0 / n)
    inv_c = jnp.float32(1.0 / c)
    loss = loss_sum * inv_n
    nll = nll_sum * inv_n
    return epsilon * (loss * inv_c) + (1.0 - 2.0 * epsilon) * nll


def _reference(preds, target, epsilon=EPSILON):
    # Pure-JAX reference of the PyTorch forward (linear_combination uses 1-2*eps).
    lp = jax.nn.log_softmax(preds.astype(jnp.float32), axis=-1)
    c = preds.shape[-1]
    loss = jnp.mean(-jnp.sum(lp, axis=-1))
    nll = jnp.mean(-jnp.take_along_axis(lp, target[:, None], axis=-1)[:, 0])
    return epsilon * (loss / c) + (1.0 - 2.0 * epsilon) * nll


if __name__ == "__main__":
    key = jax.random.PRNGKey(0)
    k1, k2, k3, k4 = jax.random.split(key, 4)

    # Case 1: small, tile-aligned batch of logits (N=8, C=32).
    # NOTE: for C << 128 and tiny N, plain XLA would beat any Pallas launch;
    # shapes here are a correctness smoke test of the tiled kernel.
    N, C = 8, 32
    preds = jax.random.normal(k1, (N, C), dtype=jnp.float32)
    target = jax.random.randint(k2, (N,), 0, C, dtype=jnp.int32)
    out = jax.block_until_ready(label_smoothing_cross_entropy(preds, target))
    ref = _reference(preds, target)
    assert jnp.allclose(out, ref, rtol=1e-5, atol=1e-5), (out, ref)

    # Case 2: N not a multiple of the row tile -> exercises tail-row masking.
    N2, C2 = 10, 32
    preds2 = jax.random.normal(k3, (N2, C2), dtype=jnp.float32)
    target2 = jax.random.randint(k4, (N2,), 0, C2, dtype=jnp.int32)
    out2 = jax.block_until_ready(label_smoothing_cross_entropy(preds2, target2))
    ref2 = _reference(preds2, target2)
    assert jnp.allclose(out2, ref2, rtol=1e-5, atol=1e-5), (out2, ref2)

    print("KERNEL_OK")
</pallas_src>

<mosaic_0001>
module attributes {stable_mosaic.version = 11 : i64} {
  func.func @_ls_ce_tile_kernel(%arg0: i32, %arg1: memref<8x32xf32, #tpu.memory_space<vmem>>, %arg2: memref<8x1xi32, #tpu.memory_space<vmem>>, %arg3: memref<8x128xf32, #tpu.memory_space<vmem>>) attributes {dimension_semantics = [#tpu.dimension_semantics<parallel>], iteration_bounds = array<i64: 1>, scalar_prefetch = 0 : i64, scratch_operands = 0 : i64, tpu.core_type = #tpu.core_type<tc>, window_params = [{transform_indices = @transform_0, window_bounds = array<i64: 8, 32>}, {transform_indices = @transform_1, window_bounds = array<i64: 8, 1>}, {transform_indices = @transform_2, window_bounds = array<i64: 8, 128>}]} {
    %c0 = arith.constant 0 : index
    %c0_0 = arith.constant 0 : index
    %0 = vector.load %arg1[%c0, %c0_0] : memref<8x32xf32, #tpu.memory_space<vmem>>, vector<8x32xf32>
    %cst = arith.constant dense<0xFF800000> : vector<8xf32>
    %1 = vector.multi_reduction <maximumf>, %0, %cst [1] : vector<8x32xf32> to vector<8xf32>
    %2 = vector.shape_cast %1 : vector<8xf32> to vector<8x1xf32>
    %c0_1 = arith.constant 0 : index
    %c0_2 = arith.constant 0 : index
    %3 = vector.load %arg2[%c0_1, %c0_2] : memref<8x1xi32, #tpu.memory_space<vmem>>, vector<8x1xi32>
    %4 = tpu.iota {dimensions = array<i32: 1>} : vector<8x32xi32>
    %5 = vector.broadcast %3 : vector<8x1xi32> to vector<8x32xi32>
    %6 = arith.cmpi eq, %4, %5 : vector<8x32xi32>
    %cst_3 = arith.constant 0.000000e+00 : f32
    %7 = vector.broadcast %cst_3 : f32 to vector<8x32xf32>
    %8 = arith.select %6, %0, %7 : vector<8x32xi1>, vector<8x32xf32>
    %cst_4 = arith.constant dense<0.000000e+00> : vector<8xf32>
    %9 = vector.multi_reduction <add>, %8, %cst_4 [1] : vector<8x32xf32> to vector<8xf32>
    %10 = vector.shape_cast %9 : vector<8xf32> to vector<8x1xf32>
    %cst_5 = arith.constant dense<0.000000e+00> : vector<8xf32>
    %11 = vector.multi_reduction <add>, %0, %cst_5 [1] : vector<8x32xf32> to vector<8xf32>
    %12 = vector.shape_cast %11 : vector<8xf32> to vector<8x1xf32>
    %13 = vector.broadcast %2 : vector<8x1xf32> to vector<8x32xf32>
    %14 = arith.subf %0, %13 : vector<8x32xf32>
    %15 = math.exp %14 : vector<8x32xf32>
    %cst_6 = arith.constant dense<0.000000e+00> : vector<8xf32>
    %16 = vector.multi_reduction <add>, %15, %cst_6 [1] : vector<8x32xf32> to vector<8xf32>
    %17 = vector.shape_cast %16 : vector<8xf32> to vector<8x1xf32>
    %18 = math.log %17 : vector<8x1xf32>
    %19 = arith.addf %2, %18 : vector<8x1xf32>
    %cst_7 = arith.constant 3.200000e+01 : f32
    %20 = vector.broadcast %cst_7 : f32 to vector<8x1xf32>
    %21 = arith.mulf %20, %19 : vector<8x1xf32>
    %22 = arith.subf %12, %21 : vector<8x1xf32>
    %23 = arith.subf %10, %19 : vector<8x1xf32>
    %24 = tpu.iota {dimensions = array<i32: 0>} : vector<8x1xi32>
    %c8_i32 = arith.constant 8 : i32
    %25 = arith.muli %arg0, %c8_i32 : i32
    %26 = vector.broadcast %25 : i32 to vector<8x1xi32>
    %27 = arith.addi %26, %24 : vector<8x1xi32>
    %c8_i32_8 = arith.constant 8 : i32
    %28 = vector.broadcast %c8_i32_8 : i32 to vector<8x1xi32>
    %29 = arith.cmpi slt, %27, %28 : vector<8x1xi32>
    %cst_9 = arith.constant 0.000000e+00 : f32
    %30 = vector.broadcast %cst_9 : f32 to vector<8x1xf32>
    %31 = arith.subf %30, %22 : vector<8x1xf32>
    %cst_10 = arith.constant 0.000000e+00 : f32
    %32 = vector.broadcast %cst_10 : f32 to vector<8x1xf32>
    %33 = arith.select %29, %31, %32 : vector<8x1xi1>, vector<8x1xf32>
    %34 = vector.shape_cast %33 : vector<8x1xf32> to vector<1x8x1xf32>
    %cst_11 = arith.constant dense<0.000000e+00> : vector<1xf32>
    %35 = vector.multi_reduction <add>, %34, %cst_11 [1, 2] : vector<1x8x1xf32> to vector<1xf32>
    %36 = vector.shape_cast %35 : vector<1xf32> to vector<1x1x1xf32>
    %37 = vector.extract %36[0, 0, 0] : f32 from vector<1x1x1xf32>
    %cst_12 = arith.constant 0.000000e+00 : f32
    %38 = vector.broadcast %cst_12 : f32 to vector<8x1xf32>
    %39 = arith.subf %38, %23 : vector<8x1xf32>
    %cst_13 = arith.constant 0.000000e+00 : f32
    %40 = vector.broadcast %cst_13 : f32 to vector<8x1xf32>
    %41 = arith.select %29, %39, %40 : vector<8x1xi1>, vector<8x1xf32>
    %42 = vector.shape_cast %41 : vector<8x1xf32> to vector<1x8x1xf32>
    %cst_14 = arith.constant dense<0.000000e+00> : vector<1xf32>
    %43 = vector.multi_reduction <add>, %42, %cst_14 [1, 2] : vector<1x8x1xf32> to vector<1xf32>
    %44 = vector.shape_cast %43 : vector<1xf32> to vector<1x1x1xf32>
    %45 = vector.extract %44[0, 0, 0] : f32 from vector<1x1x1xf32>
    %46 = tpu.iota {dimensions = array<i32: 0>} : vector<8x128xi32>
    %47 = tpu.iota {dimensions = array<i32: 1>} : vector<8x128xi32>
    %c0_i32 = arith.constant 0 : i32
    %48 = vector.broadcast %c0_i32 : i32 to vector<8x128xi32>
    %49 = arith.cmpi eq, %46, %48 : vector<8x128xi32>
    %c0_i32_15 = arith.constant 0 : i32
    %50 = vector.broadcast %c0_i32_15 : i32 to vector<8x128xi32>
    %51 = arith.cmpi eq, %47, %50 : vector<8x128xi32>
    %52 = arith.andi %49, %51 : vector<8x128xi1>
    %c0_i32_16 = arith.constant 0 : i32
    %53 = vector.broadcast %c0_i32_16 : i32 to vector<8x128xi32>
    %54 = arith.cmpi eq, %46, %53 : vector<8x128xi32>
    %c1_i32 = arith.constant 1 : i32
    %55 = vector.broadcast %c1_i32 : i32 to vector<8x128xi32>
    %56 = arith.cmpi eq, %47, %55 : vector<8x128xi32>
    %57 = arith.andi %54, %56 : vector<8x128xi1>
    %cst_17 = arith.constant 0.000000e+00 : f32
    %58 = vector.broadcast %45 : f32 to vector<8x128xf32>
    %59 = vector.broadcast %cst_17 : f32 to vector<8x128xf32>
    %60 = arith.select %57, %58, %59 : vector<8x128xi1>, vector<8x128xf32>
    %61 = vector.broadcast %37 : f32 to vector<8x128xf32>
    %62 = arith.select %52, %61, %60 : vector<8x128xi1>, vector<8x128xf32>
    %c0_18 = arith.constant 0 : index
    %c0_19 = arith.constant 0 : index
    %63 = vector.load %arg3[%c0_18, %c0_19] : memref<8x128xf32, #tpu.memory_space<vmem>>, vector<8x128xf32>
    tpu.vector_store %arg3[%c0_18, %c0_19], %62 {strides = array<i32>} : memref<8x128xf32, #tpu.memory_space<vmem>>, vector<8x128xf32>,
    return
  }
  func.func @transform_0(%arg0: i32) -> (i32, i32) {
    %c0_i32 = arith.constant 0 : i32
    %c0_i32_0 = arith.constant 0 : i32
    return %arg0, %c0_i32 : i32, i32
  }
  func.func @transform_1(%arg0: i32) -> (i32, i32) {
    %c0_i32 = arith.constant 0 : i32
    %c0_i32_0 = arith.constant 0 : i32
    return %arg0, %c0_i32 : i32, i32
  }
  func.func @transform_2(%arg0: i32) -> (i32, i32) {
    %c0_i32 = arith.constant 0 : i32
    %c0_i32_0 = arith.constant 0 : i32
    return %arg0, %c0_i32 : i32, i32
  }
}

</mosaic_0001>

<bundles_post_ra>
// kernel: tpu_custom_call.1
= control target key start
LH: loop header
LB: loop body
LE: loop exit
PB: predicated region body
PF: predicated region fallthrough
CT: control target
= control target key end

     0   :  { %vm13_vm0 = vcmask 261120   ;;  %s172_s0 = inlined_call_operand.vmem [shape: f32[8,32], index: 0, kind: input, shape index: {}]   ;;  %s173_s1 = inlined_call_operand.vmem [shape: s32[8,1], index: 1, kind: input, shape index: {}]   ;;  %s174_s2 = inlined_call_operand.hbm [shape: f32[8,128], index: 2, kind: output, shape index: {}]  }
   0x1   :  { %v12_v0 = vld [vmem:[%s172_s0] sm:$0xff] }
   0x2   :  { %7 = vsyncpa [#allocation3], 0  ;;  %v14_v1 = vsel %vm13_vm0, %v12_v0, -inf  ;;  %v133_v2 = vmov 0   ;;  %v17_v3 = vld [vmem:[%s173_s1] sm:$0xff]  ;;  %v18_v7 = vlaneseq  ;;  %v28_v14 = vsel %vm13_vm0, %v12_v0, 0.0 }
   0x3   :  { %104 = vset.pattern.permute.xlu0 %v133_v2  ;;  %vm51_vm2 = vcmask 7168   ;;  %s134_s1 = smov [#allocation2]  }
   0x4   :  { %15 = vmax.xlane.f32.xlu0 %v14_v1  ;;  %v19_v8 = vand.u32 127, %v18_v7  ;;  %v44_v42 = vshrl.u32 %v18_v7, 7  ;;  %s90_s13 = sshll.u32 %s134_s1, 4  ;;  %s91_s13 = int_to_ptr.vmem [resolvable:$true] %s90_s13 }
   0x5   :  { %s109_s15 = scalar_lea.vmem %s91_s13, 128  ;;  %p114_p1 = scmp.lt.s32.totalorder %s91_s13, %s91_s13 }
   0x6   :  { %vm74_vm3 = vcmp.eq.s32.totalorder %v44_v42, 0  ;;  %vm77_vm4 = vcmp.eq.s32.totalorder %v19_v8, 1  ;;  %vm75_vm5 = vcmp.eq.s32.totalorder %v19_v8, 0  ;;  %p110_p0 = scmp.ne.s32.totalorder %s91_s13, %s109_s15  ;;  %p115_p2 = scmp.lt.s32.totalorder %s109_s15, %s109_s15 }
   0x7   :  { %vm78_vm6 = vmand %vm74_vm3, %vm77_vm4 }
   0x8   :  { %vm76_vm7 = vmand %vm74_vm3, %vm75_vm5  ;;  %p116_p3 = por %p115_p2, %p114_p1 }
   0xa   :  { %p117_p4 = pnand %p116_p3, %p110_p0 }
  0x1a   :  { %21 = vperm.xlu0 %104, %v17_v3  }
  0x91   :  { %v16_v4 = vpop.xlane.xlu0 %15 }
  0x92   :  { %v31_v5 = vsub.f32 %v12_v0, %v16_v4 }
  0x94   :  { %v32_v6 = vmul.f32 1.442695, %v31_v5 }
  0x96   :  { %105 = vpow2.f32 %v32_v6 }
  0x99   :  { %v22_v9 = vpop.permute.xlu0 %21 }
  0x9a   :  { %vm23_vm1 = vcmp.eq.s32.totalorder %v19_v8, %v22_v9 }
  0x9b   :  { %v24_v11 = vsel %vm23_vm1, %v12_v0, 0.0 }
  0x9c   :  { %v25_v13 = vsel %vm13_vm0, %v24_v11, 0.0 }
  0xa0   :  { %v106_v10 = vpop.eup %105 }
  0xa1   :  { %v34_v12 = vsel %vm13_vm0, %v106_v10, 0.0 }
  0xa2   :  { %35 = vadd.xlane.f32.xlu1 %v34_v12 }
  0xa6   :  { %26 = vadd.xlane.f32.xlu1 %v25_v13 }
  0xaa   :  { %29 = vadd.xlane.f32.xlu1 %v28_v14 }
 0x12f   :  { %v36_v15 = vpop.xlane.xlu1 %35 }
 0x130   :  { %107 = vlog2.f32 %v36_v15 }
 0x133   :  { %v27_v16 = vpop.xlane.xlu1 %26 }
 0x137   :  { %v30_v20 = vpop.xlane.xlu1 %29 }
 0x13a   :  { %v108_v17 = vpop.eup %107 }
 0x13b   :  { %v38_v18 = vmul.f32 0.6931472, %v108_v17 }
 0x13d   :  { %v39_v19 = vadd.f32 %v38_v18, %v16_v4 }
 0x13f   :  { %v40_v21 = vmul.f32 32.0, %v39_v19  ;;  %v42_v22 = vsub.f32 %v27_v16, %v39_v19 }
 0x141   :  { %v41_v23 = vsub.f32 %v30_v20, %v40_v21  ;;  %v62_v25 = vsub.f32 0.0, %v42_v22 }
 0x143   :  { %v49_v24 = vsub.f32 0.0, %v41_v23  ;;  %v64_v27 = vsel %vm51_vm2, %v62_v25, 0.0 }
 0x145   :  { %v52_v26 = vsel %vm51_vm2, %v49_v24, 0.0 }
 0x146   :  { %53 = vadd.xlane.f32.xlu1 %v52_v26 }
 0x14a   :  { %65 = vadd.xlane.f32.xlu1 %v64_v27 }
 0x1d3   :  { %v54_v28 = vpop.xlane.xlu1 %53 }
 0x1d4   :  { %v55_v29 = vrot.slane %v54_v28, 4 }
 0x1d6   :  { %v56_v30 = vadd.f32 %v55_v29, %v54_v28 }
 0x1d7   :  { %v66_v31 = vpop.xlane.xlu1 %65 }
 0x1d8   :  { %v57_v32 = vrot.slane %v56_v30, 2  ;;  %v67_v33 = vrot.slane %v66_v31, 4 }
 0x1da   :  { %v68_v34 = vadd.f32 %v67_v33, %v66_v31  ;;  %v58_v35 = vadd.f32 %v57_v32, %v56_v30 }
 0x1dc   :  { %v69_v36 = vrot.slane %v68_v34, 2  ;;  %v59_v37 = vrot.slane %v58_v35, 1 }
 0x1de   :  { %v70_v38 = vadd.f32 %v69_v36, %v68_v34  ;;  %v60_v39 = vadd.f32 %v59_v37, %v58_v35 }
 0x1e0   :  { %98 = vpush %v60_v39  ;;  %v71_v40 = vrot.slane %v70_v38, 1 }
 0x1e2   :  { %v72_v41 = vadd.f32 %v71_v40, %v70_v38 }
 0x1e4   :  { %100 = vpush %v72_v41 }
 0x211   :  { %s99_s0 = spop %98 }
 0x212   :  { %v81_v44 = vstv %s99_s0 }
 0x215   :  { %s101_s14 = spop %100 }
 0x216   :  { %v79_v43 = vstv %s101_s14 }
 0x217   :  { %v80_v45 = vsel %vm78_vm6, %v79_v43, 0.0 }
 0x218   :  { %v82_v46 = vsel %vm76_vm7, %v81_v44, %v80_v45 }
 0x219   :  { %83 = vst [vmem:[#allocation2] sm:$0xff] %v82_v46 }
 0x21a   :  { %120 = shalt.err (!%p117_p4)
}
 0x21b   :  { %s121_s18 = scalar_lea.hbm %s174_s2, 128 }
 0x21c   :  { %p122_p5 = scmp.ne.s32.totalorder %s174_s2, %s121_s18  ;;  %p125_p6 = scmp.lt.u32.totalorder %s121_s18, %s174_s2 }
 0x21e   :  { %p127_p7 = pnand %p125_p6, %p122_p5 }
 0x220   :  { %130 = shalt.err (!%p127_p7)
}
 0x221   :  { %93 = dma.vmem_to_hbm [thread:$0]  %s91_s13, 128, %s174_s2, [#allocation3]  }
 0x222   :  { %131 = dma.done.wait [#allocation3], 128  }
 0x223   :  { %132 = vsyncadd [#allocation3], 4294967168 }
 0x224   :  { %97 = vsyncpa [#allocation3], 1 }

</bundles_post_ra>
